<compile_context>
chip_gen: v7x
topology: tpu7x:2x2x1
jax: 0.10.0
libtpu: 0.0.40
codegen_flags: <defaults>
</compile_context>

<pallas_src>
import jax
import jax.numpy as jnp
from jax.experimental import pallas as pl
from jax.experimental.pallas import tpu as pltpu

# shared.NUM_OF_INTERP_POINTS — synthetic value for this self-contained script
NUM_OF_INTERP_POINTS = 32
D_IN = NUM_OF_INTERP_POINTS * 3   # 96
H1 = 128
H2 = 64
D_OUT = 26
D_OUT_PAD = 128                   # lane-dense padded output width

DEFAULT_TB = 512                  # bounded batch tile (sweepable: 512..4096)


def _mlp_kernel(x_ref, w1_ref, b1_ref, w2_ref, b2_ref, w3_ref, b3_ref, o_ref):
    # fc1 + relu : bf16 MXU operands, f32 accumulation, f32 epilogue
    h1 = jnp.dot(x_ref[...], w1_ref[...], preferred_element_type=jnp.float32)
    h1 = jnp.maximum(h1 + b1_ref[...], 0.0)
    # fc2 + relu (re-quantize activation to bf16 for the MXU)
    h2 = jnp.dot(h1.astype(w2_ref.dtype), w2_ref[...],
                 preferred_element_type=jnp.float32)
    h2 = jnp.maximum(h2 + b2_ref[...], 0.0)
    # out (logits, no activation) into lane-dense 128-wide padded columns
    logits = jnp.dot(h2.astype(w3_ref.dtype), w3_ref[...],
                     preferred_element_type=jnp.float32)
    o_ref[...] = (logits + b3_ref[...]).astype(o_ref.dtype)


def ann_forward(x, params, *, tb=DEFAULT_TB):
    """x: (B, D_IN) float32. params: dict of w1,b1,w2,b2,w3,b3 (f32)."""
    B = x.shape[0]

    # Bounded batch tile: multiple of 8 (sublane), never bigger than needed.
    tb = int(min(tb, pl.cdiv(max(B, 1), 8) * 8))
    tb = max(8, (tb // 8) * 8)
    Bp = pl.cdiv(B, tb) * tb                 # padded batch (multiple of tb)

    compute_dtype = jnp.bfloat16

    # bf16 matmul operands halve the dominant x-stream HBM bytes.
    xq = x.astype(compute_dtype)
    if Bp != B:
        xq = jnp.pad(xq, ((0, Bp - B), (0, 0)))

    w1 = params["w1"].astype(compute_dtype)
    b1 = params["b1"].astype(jnp.float32)
    w2 = params["w2"].astype(compute_dtype)
    b2 = params["b2"].astype(jnp.float32)
    # Zero-pad the output projection to a lane-dense 128-wide slab.
    w3 = jnp.pad(params["w3"], ((0, 0), (0, D_OUT_PAD - D_OUT))).astype(compute_dtype)
    b3 = jnp.pad(params["b3"], ((0, 0), (0, D_OUT_PAD - D_OUT))).astype(jnp.float32)

    grid = (Bp // tb,)
    out = pl.pallas_call(
        _mlp_kernel,
        out_shape=jax.ShapeDtypeStruct((Bp, D_OUT_PAD), jnp.float32),
        grid_spec=pl.GridSpec(
            grid=grid,
            in_specs=[
                pl.BlockSpec((tb, D_IN), lambda i: (i, 0)),        # x tile
                pl.BlockSpec((D_IN, H1), lambda i: (0, 0)),        # W1 (resident)
                pl.BlockSpec((1, H1), lambda i: (0, 0)),           # b1
                pl.BlockSpec((H1, H2), lambda i: (0, 0)),          # W2 (resident)
                pl.BlockSpec((1, H2), lambda i: (0, 0)),           # b2
                pl.BlockSpec((H2, D_OUT_PAD), lambda i: (0, 0)),   # W3 padded
                pl.BlockSpec((1, D_OUT_PAD), lambda i: (0, 0)),    # b3 padded
            ],
            out_specs=pl.BlockSpec((tb, D_OUT_PAD), lambda i: (i, 0)),
        ),
        compiler_params=pltpu.CompilerParams(
            dimension_semantics=("parallel",),
            vmem_limit_bytes=32 * 1024 * 1024,
        ),
    )(xq, w1, b1, w2, b2, w3, b3)

    # Strip batch padding and the lane padding of the output projection.
    return out[:B, :D_OUT]


def init_params(key):
    """Deterministic init matching nn.Linear shapes (stored transposed)."""
    ks = jax.random.split(key, 6)

    def linear(kw, kb, fan_in, fan_out):
        bound = 1.0 / jnp.sqrt(fan_in)
        w = jax.random.uniform(kw, (fan_in, fan_out), jnp.float32, -bound, bound)
        b = jax.random.uniform(kb, (1, fan_out), jnp.float32, -bound, bound)
        return w, b

    w1, b1 = linear(ks[0], ks[1], D_IN, H1)
    w2, b2 = linear(ks[2], ks[3], H1, H2)
    w3, b3 = linear(ks[4], ks[5], H2, D_OUT)
    return {"w1": w1, "b1": b1, "w2": w2, "b2": b2, "w3": w3, "b3": b3}


def reference_forward(x, p):
    """Mirror of the kernel numerics: bf16 matmul operands, f32 accumulation."""
    def bf(a):
        return a.astype(jnp.bfloat16).astype(jnp.float32)

    h1 = jax.nn.relu(jnp.dot(bf(x), bf(p["w1"])) + p["b1"])
    h2 = jax.nn.relu(jnp.dot(bf(h1), bf(p["w2"])) + p["b2"])
    return jnp.dot(bf(h2), bf(p["w3"])) + p["b3"]


if __name__ == "__main__":
    key = jax.random.PRNGKey(0)
    kx, kp = jax.random.split(key)
    params = init_params(kp)

    # Small test batch (tile clamps to 8 rows, single grid step).
    B = 8
    x = jax.random.normal(kx, (B, D_IN), jnp.float32)
    out = jax.block_until_ready(ann_forward(x, params))
    ref = reference_forward(x, params)
    assert out.shape == (B, D_OUT)
    assert jnp.allclose(out, ref, atol=1e-2, rtol=1e-2)

    # Batch not divisible by the tile exercises the padded-last-tile path.
    B2 = 10
    x2 = jax.random.normal(kx, (B2, D_IN), jnp.float32)
    out2 = jax.block_until_ready(ann_forward(x2, params))
    ref2 = reference_forward(x2, params)
    assert out2.shape == (B2, D_OUT)
    assert jnp.allclose(out2, ref2, atol=1e-2, rtol=1e-2)

    print("KERNEL_OK")
</pallas_src>

<mosaic_0001>
module attributes {stable_mosaic.version = 11 : i64} {
  func.func @_mlp_kernel(%arg0: i32, %arg1: memref<8x96xbf16, #tpu.memory_space<vmem>>, %arg2: memref<96x128xbf16, #tpu.memory_space<vmem>>, %arg3: memref<1x128xf32, #tpu.memory_space<vmem>>, %arg4: memref<128x64xbf16, #tpu.memory_space<vmem>>, %arg5: memref<1x64xf32, #tpu.memory_space<vmem>>, %arg6: memref<64x128xbf16, #tpu.memory_space<vmem>>, %arg7: memref<1x128xf32, #tpu.memory_space<vmem>>, %arg8: memref<8x128xf32, #tpu.memory_space<vmem>>) attributes {dimension_semantics = [#tpu.dimension_semantics<parallel>], iteration_bounds = array<i64: 1>, scalar_prefetch = 0 : i64, scratch_operands = 0 : i64, tpu.core_type = #tpu.core_type<tc>, window_params = [{transform_indices = @transform_0, window_bounds = array<i64: 8, 96>}, {pipeline_mode = #tpu.pipeline_mode<synchronous>, transform_indices = @transform_1, window_bounds = array<i64: 96, 128>}, {pipeline_mode = #tpu.pipeline_mode<synchronous>, transform_indices = @transform_2, window_bounds = array<i64: 1, 128>}, {pipeline_mode = #tpu.pipeline_mode<synchronous>, transform_indices = @transform_3, window_bounds = array<i64: 128, 64>}, {pipeline_mode = #tpu.pipeline_mode<synchronous>, transform_indices = @transform_4, window_bounds = array<i64: 1, 64>}, {pipeline_mode = #tpu.pipeline_mode<synchronous>, transform_indices = @transform_5, window_bounds = array<i64: 64, 128>}, {pipeline_mode = #tpu.pipeline_mode<synchronous>, transform_indices = @transform_6, window_bounds = array<i64: 1, 128>}, {transform_indices = @transform_7, window_bounds = array<i64: 8, 128>}]} {
    %c0 = arith.constant 0 : index
    %c0_0 = arith.constant 0 : index
    %0 = vector.load %arg1[%c0, %c0_0] : memref<8x96xbf16, #tpu.memory_space<vmem>>, vector<8x96xbf16>
    %c0_1 = arith.constant 0 : index
    %c0_2 = arith.constant 0 : index
    %1 = vector.load %arg2[%c0_1, %c0_2] : memref<96x128xbf16, #tpu.memory_space<vmem>>, vector<96x128xbf16>
    %cst = arith.constant dense<0.000000e+00> : vector<8x128xf32>
    %2 = tpu.matmul %0, %1, %cst {dimension_numbers = #tpu.dot_dimension_numbers<[1], [0], [0], [1], [0, 0, 1, 1], [], []>} : vector<8x96xbf16>, vector<96x128xbf16>, vector<8x128xf32> -> vector<8x128xf32>
    %c0_3 = arith.constant 0 : index
    %c0_4 = arith.constant 0 : index
    %3 = vector.load %arg3[%c0_3, %c0_4] : memref<1x128xf32, #tpu.memory_space<vmem>>, vector<1x128xf32>
    %4 = vector.broadcast %3 : vector<1x128xf32> to vector<8x128xf32>
    %5 = arith.addf %2, %4 : vector<8x128xf32>
    %cst_5 = arith.constant 0.000000e+00 : f32
    %6 = vector.broadcast %cst_5 : f32 to vector<8x128xf32>
    %7 = arith.maximumf %5, %6 : vector<8x128xf32>
    %8 = arith.truncf %7 : vector<8x128xf32> to vector<8x128xbf16>
    %c0_6 = arith.constant 0 : index
    %c0_7 = arith.constant 0 : index
    %9 = vector.load %arg4[%c0_6, %c0_7] : memref<128x64xbf16, #tpu.memory_space<vmem>>, vector<128x64xbf16>
    %cst_8 = arith.constant dense<0.000000e+00> : vector<8x64xf32>
    %10 = tpu.matmul %8, %9, %cst_8 {dimension_numbers = #tpu.dot_dimension_numbers<[1], [0], [0], [1], [0, 0, 1, 1], [], []>} : vector<8x128xbf16>, vector<128x64xbf16>, vector<8x64xf32> -> vector<8x64xf32>
    %c0_9 = arith.constant 0 : index
    %c0_10 = arith.constant 0 : index
    %11 = vector.load %arg5[%c0_9, %c0_10] : memref<1x64xf32, #tpu.memory_space<vmem>>, vector<1x64xf32>
    %12 = vector.broadcast %11 : vector<1x64xf32> to vector<8x64xf32>
    %13 = arith.addf %10, %12 : vector<8x64xf32>
    %cst_11 = arith.constant 0.000000e+00 : f32
    %14 = vector.broadcast %cst_11 : f32 to vector<8x64xf32>
    %15 = arith.maximumf %13, %14 : vector<8x64xf32>
    %16 = arith.truncf %15 : vector<8x64xf32> to vector<8x64xbf16>
    %c0_12 = arith.constant 0 : index
    %c0_13 = arith.constant 0 : index
    %17 = vector.load %arg6[%c0_12, %c0_13] : memref<64x128xbf16, #tpu.memory_space<vmem>>, vector<64x128xbf16>
    %cst_14 = arith.constant dense<0.000000e+00> : vector<8x128xf32>
    %18 = tpu.matmul %16, %17, %cst_14 {dimension_numbers = #tpu.dot_dimension_numbers<[1], [0], [0], [1], [0, 0, 1, 1], [], []>} : vector<8x64xbf16>, vector<64x128xbf16>, vector<8x128xf32> -> vector<8x128xf32>
    %c0_15 = arith.constant 0 : index
    %c0_16 = arith.constant 0 : index
    %19 = vector.load %arg7[%c0_15, %c0_16] : memref<1x128xf32, #tpu.memory_space<vmem>>, vector<1x128xf32>
    %20 = vector.broadcast %19 : vector<1x128xf32> to vector<8x128xf32>
    %21 = arith.addf %18, %20 : vector<8x128xf32>
    %c0_17 = arith.constant 0 : index
    %c0_18 = arith.constant 0 : index
    %22 = vector.load %arg8[%c0_17, %c0_18] : memref<8x128xf32, #tpu.memory_space<vmem>>, vector<8x128xf32>
    tpu.vector_store %arg8[%c0_17, %c0_18], %21 {strides = array<i32>} : memref<8x128xf32, #tpu.memory_space<vmem>>, vector<8x128xf32>,
    return
  }
  func.func @transform_0(%arg0: i32) -> (i32, i32) {
    %c0_i32 = arith.constant 0 : i32
    %c0_i32_0 = arith.constant 0 : i32
    return %arg0, %c0_i32 : i32, i32
  }
  func.func @transform_1(%arg0: i32) -> (i32, i32) {
    %c0_i32 = arith.constant 0 : i32
    %c0_i32_0 = arith.constant 0 : i32
    %c0_i32_1 = arith.constant 0 : i32
    return %c0_i32, %c0_i32_0 : i32, i32
  }
  func.func @transform_2(%arg0: i32) -> (i32, i32) {
    %c0_i32 = arith.constant 0 : i32
    %c0_i32_0 = arith.constant 0 : i32
    %c0_i32_1 = arith.constant 0 : i32
    return %c0_i32, %c0_i32_0 : i32, i32
  }
  func.func @transform_3(%arg0: i32) -> (i32, i32) {
    %c0_i32 = arith.constant 0 : i32
    %c0_i32_0 = arith.constant 0 : i32
    %c0_i32_1 = arith.constant 0 : i32
    return %c0_i32, %c0_i32_0 : i32, i32
  }
  func.func @transform_4(%arg0: i32) -> (i32, i32) {
    %c0_i32 = arith.constant 0 : i32
    %c0_i32_0 = arith.constant 0 : i32
    %c0_i32_1 = arith.constant 0 : i32
    return %c0_i32, %c0_i32_0 : i32, i32
  }
  func.func @transform_5(%arg0: i32) -> (i32, i32) {
    %c0_i32 = arith.constant 0 : i32
    %c0_i32_0 = arith.constant 0 : i32
    %c0_i32_1 = arith.constant 0 : i32
    return %c0_i32, %c0_i32_0 : i32, i32
  }
  func.func @transform_6(%arg0: i32) -> (i32, i32) {
    %c0_i32 = arith.constant 0 : i32
    %c0_i32_0 = arith.constant 0 : i32
    %c0_i32_1 = arith.constant 0 : i32
    return %c0_i32, %c0_i32_0 : i32, i32
  }
  func.func @transform_7(%arg0: i32) -> (i32, i32) {
    %c0_i32 = arith.constant 0 : i32
    %c0_i32_0 = arith.constant 0 : i32
    return %arg0, %c0_i32 : i32, i32
  }
}

</mosaic_0001>

<bundles_post_ra>
// kernel: tpu_custom_call.1
= control target key start
LH: loop header
LB: loop body
LE: loop exit
PB: predicated region body
PF: predicated region fallthrough
CT: control target
= control target key end

     0   :  { %v478_v1 = vmov 0.0   ;;  %vm479_vm0 = vmmov 0   ;;  %s623_s0 = inlined_call_operand.vmem [shape: bf16[8,96], index: 0, kind: input, shape index: {}]   ;;  %s624_s1 = inlined_call_operand.vmem [shape: bf16[96,128], index: 1, kind: input, shape index: {}]   ;;  %s625_s2 = inlined_call_operand.vmem [shape: f32[1,128], index: 2, kind: input, shape index: {}]   ;;  %s626_s3 = inlined_call_operand.vmem [shape: bf16[128,64], index: 3, kind: input, shape index: {}]   ;;  %s627_s4 = inlined_call_operand.vmem [shape: f32[1,64], index: 4, kind: input, shape index: {}]   ;;  %s628_s5 = inlined_call_operand.vmem [shape: bf16[64,128], index: 5, kind: input, shape index: {}]   ;;  %s629_s6 = inlined_call_operand.vmem [shape: f32[1,128], index: 6, kind: input, shape index: {}]   ;;  %s630_s7 = inlined_call_operand.hbm [shape: f32[8,128], index: 7, kind: output, shape index: {}]  }
   0x1   :  { %v436_v0 = vld [vmem:[%s624_s1] sm:$0xff]   ;;  %385 = vmatprep.subr.bf16.mxu0 %v478_v1  ;;  %401 = vmatprep.subr.bf16.mxu1 %v478_v1  ;;  %v437_v2 = vld [vmem:[%s624_s1 + $0x8] sm:$0xff]   ;;  %v438_v3 = vld [vmem:[%s624_s1 + $0x10] sm:$0xff]  }
   0x2   :  { %386 = vmatpush3.bf16.msra.mxu0 %v436_v0  ;;  %397 = vmatprep.mubr.msk.bf16.mxu0 %vm479_vm0, %v478_v1  ;;  %v442_v4 = vld [vmem:[%s626_s3] sm:$0xff]   ;;  %v443_v5 = vld [vmem:[%s626_s3 + $0x8] sm:$0xff]   ;;  %v439_v6 = vld [vmem:[%s624_s1 + $0x18] sm:$0xff]  }
   0x3   :  { %387 = vmatprep.subr.bf16.mxu0 %v478_v1  ;;  %417 = vmatprep.mubr.msk.bf16.mxu1 %vm479_vm0, %v478_v1  ;;  %v440_v7 = vld [vmem:[%s624_s1 + $0x20] sm:$0xff]   ;;  %v444_v8 = vld [vmem:[%s626_s3 + $0x10] sm:$0xff]  }
   0x4   :  { %402 = vmatpush3.bf16.msra.mxu1 %v442_v4 }
   0x5   :  { %403 = vmatprep.subr.bf16.mxu1 %v478_v1 }
   0x6   :  { %388 = vmatpush3.bf16.msra.mxu0 %v437_v2 }
   0x7   :  { %389 = vmatprep.subr.bf16.mxu0 %v478_v1 }
   0x8   :  { %404 = vmatpush3.bf16.msra.mxu1 %v443_v5 }
   0x9   :  { %405 = vmatprep.subr.bf16.mxu1 %v478_v1 }
   0xa   :  { %390 = vmatpush3.bf16.msra.mxu0 %v438_v3 }
   0xb   :  { %391 = vmatprep.subr.bf16.mxu0 %v478_v1 }
   0xe   :  { %392 = vmatpush3.bf16.msra.mxu0 %v439_v6 }
   0xf   :  { %393 = vmatprep.subr.bf16.mxu0 %v478_v1 }
  0x10   :  { %12 = vsyncpa [#allocation3], 0  ;;  %406 = vmatpush3.bf16.msra.mxu1 %v444_v8  ;;  %v445_v9 = vld [vmem:[%s626_s3 + $0x18] sm:$0xff]   ;;  %v441_v10 = vld [vmem:[%s624_s1 + $0x28] sm:$0xff]   ;;  %vm84_vm1 = vcmask 785408   ;;  %vm282_vm2 = vcmask 523264  }
  0x11   :  { %407 = vmatprep.subr.bf16.mxu1 %v478_v1  ;;  %v446_v11 = vld [vmem:[%s626_s3 + $0x20] sm:$0xff]   ;;  %v447_v13 = vld [vmem:[%s626_s3 + $0x28] sm:$0xff]   ;;  %v448_v14 = vld [vmem:[%s626_s3 + $0x30] sm:$0xff]   ;;  %s480_s18 = smov [#allocation2]  }
  0x12   :  { %394 = vmatpush3.bf16.msra.mxu0 %v440_v7  ;;  %v28_v12 = vld [vmem:[%s623_s0] sm:$0xf]  ;;  %v449_v15 = vld [vmem:[%s626_s3 + $0x38] sm:$0xff]   ;;  %v451_v17 = vld [vmem:[%s628_s5 + $0x8] sm:$0xff]  }
  0x13   :  { %395 = vmatprep.subr.bf16.mxu0 %v478_v1  ;;  %v450_v16 = vld [vmem:[%s628_s5] sm:$0xff]   ;;  %v452_v26 = vld [vmem:[%s628_s5 + $0x10] sm:$0xff]   ;;  %v453_v27 = vld [vmem:[%s628_s5 + $0x18] sm:$0xff]   ;;  %s333_s5 = sshll.u32 %s480_s18, 4  ;;  %s334_s5 = int_to_ptr.vmem [resolvable:$true] %s333_s5 }
  0x14   :  { %408 = vmatpush3.bf16.msra.mxu1 %v445_v9  ;;  %v341_v18 = vld [vmem:[%s625_s2] ss:$0 sm:$0xff]  ;;  %p459_p1 = scmp.lt.s32.totalorder %s334_s5, %s334_s5 }
  0x15   :  { %409 = vmatprep.subr.bf16.mxu1 %v478_v1  ;;  %v349_v28 = vld [vmem:[%s627_s4] ss:$0 sm:$0xff]  ;;  %s454_s4 = scalar_lea.vmem %s334_s5, 128 }
  0x16   :  { %396 = vmatpush3.bf16.msra.mxu0 %v441_v10  ;;  %v358_v36 = vld [vmem:[%s629_s6] ss:$0 sm:$0xff]  ;;  %p455_p0 = scmp.ne.s32.totalorder %s334_s5, %s454_s4  ;;  %p460_p2 = scmp.lt.s32.totalorder %s454_s4, %s454_s4 }
  0x17   :  { %421 = vmatprep.subr.bf16.mxu0 %v478_v1 }
  0x18   :  { %410 = vmatpush3.bf16.msra.mxu1 %v446_v11  ;;  %p461_p3 = por %p460_p2, %p459_p1 }
  0x19   :  { %398 = vmatmul.mubr.msk.bf16.vlgmr.msra.gmra.mrb[0].mxu0 %vm84_vm1, %v28_v12  ;;  %411 = vmatprep.subr.bf16.mxu1 %v478_v1 }
  0x1a   :  { %429 = vmatprep.mubr.msk.bf16.mxu0 %vm479_vm0, %v478_v1  ;;  %422 = vmatpush3.bf16.msra.mxu0 %v450_v16  ;;  %p462_p4 = pnand %p461_p3, %p455_p0 }
  0x1b   :  { %423 = vmatprep.subr.bf16.mxu0 %v478_v1 }
  0x1c   :  { %412 = vmatpush3.bf16.msra.mxu1 %v447_v13 }
  0x1d   :  { %413 = vmatprep.subr.bf16.mxu1 %v478_v1 }
  0x1e   :  { %424 = vmatpush3.bf16.msra.mxu0 %v451_v17 }
  0x1f   :  { %425 = vmatprep.subr.bf16.mxu0 %v478_v1 }
  0x20   :  { %414 = vmatpush3.bf16.msra.mxu1 %v448_v14 }
  0x21   :  { %415 = vmatprep.subr.bf16.mxu1 %v478_v1 }
  0x22   :  { %426 = vmatpush3.bf16.msra.mxu0 %v452_v26 }
  0x23   :  { %427 = vmatprep.subr.bf16.mxu0 %v478_v1 }
  0x24   :  { %416 = vmatpush3.bf16.msra.mxu1 %v449_v15 }
  0x26   :  { %428 = vmatpush3.bf16.msra.mxu0 %v453_v27 }
  0xec   :  { %v122_v19 = vpop.f32.mrb[0].mxu0 }
  0xed   :  { %v123_v20 = vadd.f32 %v341_v18, %v122_v19  ;;  %v399_v21 = vpop.f32.mrb[1].mxu0 }
  0xee   :  { %v125_v22 = vpop.f32.mrb[2].mxu0 }
  0xef   :  { %v128_v23 = vmax.f32 %v123_v20, 0.0  ;;  %v400_v24 = vpop.f32.mrb[3].mxu0 }
  0xf1   :  { %v129_v25 = vpack.c.bf16 %v128_v23, %v128_v23 }
  0xf3   :  { %418 = vmatmul.mubr.bf16.vlgmr.msra.gmra.mrb[0].mxu1 %v129_v25 }
 0x1c6   :  { %v235_v29 = vpop.f32.mrb[0].mxu1 }
 0x1c7   :  { %v236_v30 = vadd.f32 %v349_v28, %v235_v29  ;;  %v419_v31 = vpop.f32.mrb[1].mxu1 }
 0x1c8   :  { %v238_v32 = vpop.f32.mrb[2].mxu1 }
 0x1c9   :  { %v241_v33 = vmax.f32 %v236_v30, 0.0  ;;  %v420_v34 = vpop.f32.mrb[3].mxu1 }
 0x1cb   :  { %v242_v35 = vpack.c.bf16 %v241_v33, %v241_v33 }
 0x1cd   :  { %430 = vmatmul.mubr.msk.bf16.vlgmr.msra.gmra.mrb[4].mxu0 %vm282_vm2, %v242_v35 }
 0x2a0   :  { %v320_v37 = vpop.f32.mrb[4].mxu0 }
 0x2a1   :  { %v321_v38 = vadd.f32 %v358_v36, %v320_v37  ;;  %v431_v39 = vpop.f32.mrb[5].mxu0 }
 0x2a2   :  { %v323_v40 = vpop.f32.mrb[6].mxu0 }
 0x2a3   :  { %326 = vst [vmem:[#allocation2] sm:$0xff] %v321_v38  ;;  %v432_v41 = vpop.f32.mrb[7].mxu0 }
 0x2a4   :  { %465 = shalt.err (!%p462_p4)
}
 0x2a5   :  { %s466_s6 = scalar_lea.hbm %s630_s7, 128 }
 0x2a6   :  { %p467_p5 = scmp.ne.s32.totalorder %s630_s7, %s466_s6  ;;  %p470_p6 = scmp.lt.u32.totalorder %s466_s6, %s630_s7 }
 0x2a8   :  { %p472_p7 = pnand %p470_p6, %p467_p5 }
 0x2aa   :  { %475 = shalt.err (!%p472_p7)
}
 0x2ab   :  { %336 = dma.vmem_to_hbm [thread:$0]  %s334_s5, 128, %s630_s7, [#allocation3]  }
 0x2ac   :  { %476 = dma.done.wait [#allocation3], 128  }
 0x2ad   :  { %477 = vsyncadd [#allocation3], 4294967168 }
 0x2ae   :  { %340 = vsyncpa [#allocation3], 1 }

</bundles_post_ra>
